<compile_context>
chip_gen: v6e
topology: v6e:2x2x1
jax: 0.10.0
libtpu: 0.0.40
codegen_flags: <defaults>
</compile_context>

<pallas_src>
import jax
import jax.numpy as jnp
from jax import lax
from jax.experimental import pallas as pl
from jax.experimental.pallas import tpu as pltpu


def _tpu_info():
    """(tensorcores_per_chip, vmem_capacity_bytes) with safe fallbacks."""
    n_cores = None
    vmem = None
    try:
        info = pltpu.get_tpu_info()
        v = int(getattr(info, "vmem_capacity_bytes", 0))
        vmem = v if v > 0 else None
        for attr in ("num_tensorcores", "tensorcores_per_chip", "num_cores",
                     "core_count"):
            c = getattr(info, attr, None)
            if c:
                n_cores = int(c)
                break
    except Exception:
        pass
    kind = ""
    try:
        kind = jax.devices()[0].device_kind.lower()
    except Exception:
        pass
    if n_cores is None:
        n_cores = 2 if any(s in kind for s in ("v7", "7x", "v4", "v5p")) else 1
    if vmem is None:
        vmem = 64 * 1024 * 1024 if ("v7" in kind or "7x" in kind) else 128 * 1024 * 1024
    return n_cores, vmem


def _make_kernel(BM, C, CP, W, K, HW, HWS, HWP):
    taps = [(kh, kw) for kh in range(K) for kw in range(K)]
    needs_zero = (CP > C) or (HWP > HW)

    def kernel(xr_ref, xi_ref, w_ref, or_ref, oi_ref, xpad, patches):
        # xr_ref / xi_ref : (BM, C, HW)      unpadded real / imag planes
        # w_ref           : (Cout, K*K*CP)   im2col weight (zero cols for pad rows)
        # or_ref / oi_ref : (BM, Cout, HW)   lane-dense full-grid outputs
        # xpad            : VMEM (2, BM, CP, HWP)  lane/channel-padded planes
        # patches         : VMEM (K*K*CP, 2*BM*HWS) im2col patch matrix

        # Padded channels / lane tail must be zero (their weight columns are
        # zero, but 0 * stale-NaN would still poison valid lanes).  Cheap at
        # the small C where padding is actually needed.
        if needs_zero:
            xpad[...] = jnp.zeros_like(xpad)
        xpad[0, :, :C, :HW] = xr_ref[...]
        xpad[1, :, :C, :HW] = xi_ref[...]

        # Fill the patch matrix: tap rows are 8-sublane aligned (CP), lane
        # slots are 128-aligned (HWS) -> unmasked full-tile stores.
        for t, (kh, kw) in enumerate(taps):
            off = kh * W + kw
            r0 = t * CP
            for p in range(2):            # 0 = real, 1 = imag (same real weight)
                for b in range(BM):
                    c0 = (p * BM + b) * HWS
                    patches[r0:r0 + CP, c0:c0 + HW] = xpad[p, b, :, off:off + HW]

        # Single MXU push per grid step: (Cout, K*K*CP) @ (K*K*CP, 2*BM*HWS).
        res = jnp.dot(w_ref[...], patches[...],
                      preferred_element_type=jnp.float32)

        # Per-image output slices start at 128-aligned lane offsets.
        for b in range(BM):
            or_ref[b] = res[:, b * HWS: b * HWS + HW]
            oi_ref[b] = res[:, (BM + b) * HWS: (BM + b) * HWS + HW]

    return kernel


def complex_conv2d(x_cplx, weight):
    """ComplexConv forward (defaults: real 3x3 kernel, VALID, stride 1, no bias).

    x_cplx: complex64 (B, C, H, W);  weight: float32 (Cout, C, K, K).
    Returns complex64 (B, Cout, H-K+1, W-K+1).
    """
    B, C, H, W = x_cplx.shape
    Cout, C2, K, K2 = weight.shape
    assert C2 == C and K2 == K
    Ho, Wo = H - K + 1, W - K + 1
    HW = H * W
    CP = ((C + 7) // 8) * 8                       # tap channel rows padded to 8
    max_off = (K - 1) * W + (K - 1)
    HWP = ((HW + max_off + 127) // 128) * 128     # padded plane length (in VMEM)
    HWS = ((HW + 127) // 128) * 128               # 128-aligned per-image lane slot
    KKCP = K * K * CP

    # --- generation-aware batch blocking ------------------------------------
    num_cores, vmem_cap = _tpu_info()
    vmem_limit = min(64 * 1024 * 1024, (vmem_cap * 3) // 4)   # ~48 MiB v7x, 64 MiB v5e/v6e
    budget = int(0.7 * vmem_limit)
    bytes_per_img = 4 * (4 * C * HW          # dbl-buffered real+imag input blocks
                         + 4 * Cout * HW     # dbl-buffered real+imag output blocks
                         + 2 * CP * HWP      # xpad scratch
                         + 2 * KKCP * HWS)   # patches scratch
    cap = max(1, min(32, budget // max(1, bytes_per_img)))

    divisors = [d for d in range(1, B + 1) if B % d == 0]
    fitting = [d for d in divisors if d <= cap] or [1]
    if num_cores >= 2 and B >= 2:
        # multi-TC chips: want G >= 2 and ideally G a multiple of the core count
        even = [d for d in fitting
                if (B // d) >= 2 and (B // d) % num_cores == 0]
        ge2 = [d for d in fitting if (B // d) >= 2]
        pool = even or ge2 or fitting
    else:
        # single-TC chips: grid is a serial loop, just use the biggest block
        pool = fitting
    BM = max(pool)
    G = B // BM

    # --- inputs: no wrapper-side padding (reshape is layout-preserving) ------
    xr = jnp.real(x_cplx).astype(jnp.float32).reshape(B, C, HW)
    xi = jnp.imag(x_cplx).astype(jnp.float32).reshape(B, C, HW)

    # im2col weight with zero columns for the padded channel rows; row order
    # (kh, kw, c) matches the patch stacking.
    w_t = jnp.transpose(weight.astype(jnp.float32), (2, 3, 1, 0))   # (K, K, C, Cout)
    w_t = jnp.pad(w_t, ((0, 0), (0, 0), (0, CP - C), (0, 0)))
    w_flat = w_t.reshape(K * K * CP, Cout).T                        # (Cout, KKCP)

    kernel = _make_kernel(BM, C, CP, W, K, HW, HWS, HWP)

    out_re, out_im = pl.pallas_call(
        kernel,
        out_shape=(jax.ShapeDtypeStruct((B, Cout, HW), jnp.float32),
                   jax.ShapeDtypeStruct((B, Cout, HW), jnp.float32)),
        grid_spec=pltpu.PrefetchScalarGridSpec(
            num_scalar_prefetch=0,
            grid=(G,),
            in_specs=[
                pl.BlockSpec((BM, C, HW), lambda i: (i, 0, 0)),
                pl.BlockSpec((BM, C, HW), lambda i: (i, 0, 0)),
                pl.BlockSpec((Cout, KKCP), lambda i: (0, 0)),
            ],
            out_specs=[
                pl.BlockSpec((BM, Cout, HW), lambda i: (i, 0, 0)),
                pl.BlockSpec((BM, Cout, HW), lambda i: (i, 0, 0)),
            ],
            scratch_shapes=[
                pltpu.VMEM((2, BM, CP, HWP), jnp.float32),
                pltpu.VMEM((KKCP, 2 * BM * HWS), jnp.float32),
            ],
        ),
        compiler_params=pltpu.CompilerParams(
            dimension_semantics=("parallel",),
            vmem_limit_bytes=int(vmem_limit),
        ),
    )(xr, xi, w_flat)

    # Kernel writes the full lane-dense HxW grid; the valid VALID-conv region
    # is the top-left (Ho, Wo) block.  Reshape is layout-preserving; slice +
    # complex recombine fuse into one small XLA op.
    out_re = out_re.reshape(B, Cout, H, W)[:, :, :Ho, :Wo]
    out_im = out_im.reshape(B, Cout, H, W)[:, :, :Ho, :Wo]
    return lax.complex(out_re, out_im).astype(jnp.complex64)


def _reference(x_cplx, weight):
    """Pure-JAX reference mirroring the PyTorch module (complex_kernel=False)."""
    def conv(xr):
        return lax.conv_general_dilated(
            xr, weight, window_strides=(1, 1), padding="VALID",
            dimension_numbers=("NCHW", "OIHW", "NCHW"),
            precision=lax.Precision.HIGHEST)
    re = conv(jnp.real(x_cplx).astype(jnp.float32))
    im = conv(jnp.imag(x_cplx).astype(jnp.float32))
    return (re + 1j * im).astype(jnp.complex64)


if __name__ == "__main__":
    # small shapes consistent with the module defaults
    B, C, Cout, H, W, K = 2, 4, 8, 16, 16, 3

    key = jax.random.PRNGKey(0)
    k1, k2, k3 = jax.random.split(key, 3)
    x = (jax.random.normal(k1, (B, C, H, W), jnp.float32)
         + 1j * jax.random.normal(k2, (B, C, H, W), jnp.float32)).astype(jnp.complex64)
    # real-valued dense 3x3 kernel (ComplexConv defaults: complex_kernel=False, bias=False)
    weight = (jax.random.normal(k3, (Cout, C, K, K), jnp.float32) * 0.1).astype(jnp.float32)

    out = jax.jit(complex_conv2d)(x, weight)
    out = jax.block_until_ready(out)

    ref = jax.block_until_ready(_reference(x, weight))
    assert out.shape == (B, Cout, H - K + 1, W - K + 1) and out.dtype == jnp.complex64
    err = jnp.max(jnp.abs(out - ref))
    assert jnp.allclose(out, ref, atol=1e-4, rtol=1e-4), f"mismatch vs reference (max |err|={err})"

    print("KERNEL_OK")
</pallas_src>

<mosaic_0001>
module attributes {stable_mosaic.version = 11 : i64} {
  func.func @kernel(%arg0: i32, %arg1: memref<2x4x256xf32, #tpu.memory_space<vmem>>, %arg2: memref<2x4x256xf32, #tpu.memory_space<vmem>>, %arg3: memref<8x72xf32, #tpu.memory_space<vmem>>, %arg4: memref<2x8x256xf32, #tpu.memory_space<vmem>>, %arg5: memref<2x8x256xf32, #tpu.memory_space<vmem>>, %arg6: memref<2x2x8x384xf32, #tpu.memory_space<vmem>>, %arg7: memref<72x1024xf32, #tpu.memory_space<vmem>>) attributes {dimension_semantics = [#tpu.dimension_semantics<parallel>], iteration_bounds = array<i64: 1>, scalar_prefetch = 0 : i64, scratch_operands = 2 : i64, tpu.core_type = #tpu.core_type<tc>, window_params = [{transform_indices = @transform_0, window_bounds = array<i64: 2, 4, 256>}, {transform_indices = @transform_1, window_bounds = array<i64: 2, 4, 256>}, {pipeline_mode = #tpu.pipeline_mode<synchronous>, transform_indices = @transform_2, window_bounds = array<i64: 8, 72>}, {transform_indices = @transform_3, window_bounds = array<i64: 2, 8, 256>}, {transform_indices = @transform_4, window_bounds = array<i64: 2, 8, 256>}]} {
    %cst = arith.constant 0.000000e+00 : f32
    %0 = vector.broadcast %cst : f32 to vector<2x2x8x384xf32>
    %c0 = arith.constant 0 : index
    %c0_0 = arith.constant 0 : index
    %c0_1 = arith.constant 0 : index
    %c0_2 = arith.constant 0 : index
    %1 = vector.load %arg6[%c0, %c0_0, %c0_1, %c0_2] : memref<2x2x8x384xf32, #tpu.memory_space<vmem>>, vector<2x2x8x384xf32>
    tpu.vector_store %arg6[%c0, %c0_0, %c0_1, %c0_2], %0 {strides = array<i32>} : memref<2x2x8x384xf32, #tpu.memory_space<vmem>>, vector<2x2x8x384xf32>,
    %c0_3 = arith.constant 0 : index
    %c0_4 = arith.constant 0 : index
    %c0_5 = arith.constant 0 : index
    %2 = vector.load %arg1[%c0_3, %c0_4, %c0_5] : memref<2x4x256xf32, #tpu.memory_space<vmem>>, vector<2x4x256xf32>
    %c0_6 = arith.constant 0 : index
    %c0_7 = arith.constant 0 : index
    %c0_8 = arith.constant 0 : index
    %c0_9 = arith.constant 0 : index
    %3 = vector.load %arg6[%c0_6, %c0_7, %c0_8, %c0_9] : memref<2x2x8x384xf32, #tpu.memory_space<vmem>>, vector<1x2x4x256xf32>
    %4 = vector.shape_cast %3 : vector<1x2x4x256xf32> to vector<2x4x256xf32>
    %5 = vector.shape_cast %2 : vector<2x4x256xf32> to vector<1x2x4x256xf32>
    tpu.vector_store %arg6[%c0_6, %c0_7, %c0_8, %c0_9], %5 {strides = array<i32>} : memref<2x2x8x384xf32, #tpu.memory_space<vmem>>, vector<1x2x4x256xf32>,
    %c0_10 = arith.constant 0 : index
    %c0_11 = arith.constant 0 : index
    %c0_12 = arith.constant 0 : index
    %6 = vector.load %arg2[%c0_10, %c0_11, %c0_12] : memref<2x4x256xf32, #tpu.memory_space<vmem>>, vector<2x4x256xf32>
    %c1 = arith.constant 1 : index
    %c0_13 = arith.constant 0 : index
    %c0_14 = arith.constant 0 : index
    %c0_15 = arith.constant 0 : index
    %7 = vector.load %arg6[%c1, %c0_13, %c0_14, %c0_15] : memref<2x2x8x384xf32, #tpu.memory_space<vmem>>, vector<1x2x4x256xf32>
    %8 = vector.shape_cast %7 : vector<1x2x4x256xf32> to vector<2x4x256xf32>
    %9 = vector.shape_cast %6 : vector<2x4x256xf32> to vector<1x2x4x256xf32>
    tpu.vector_store %arg6[%c1, %c0_13, %c0_14, %c0_15], %9 {strides = array<i32>} : memref<2x2x8x384xf32, #tpu.memory_space<vmem>>, vector<1x2x4x256xf32>,
    %c0_16 = arith.constant 0 : index
    %c0_17 = arith.constant 0 : index
    %c0_18 = arith.constant 0 : index
    %c0_19 = arith.constant 0 : index
    %10 = vector.load %arg6[%c0_16, %c0_17, %c0_18, %c0_19] : memref<2x2x8x384xf32, #tpu.memory_space<vmem>>, vector<1x1x8x256xf32>
    %11 = vector.shape_cast %10 : vector<1x1x8x256xf32> to vector<8x256xf32>
    %c0_20 = arith.constant 0 : index
    %c0_21 = arith.constant 0 : index
    %12 = vector.load %arg7[%c0_20, %c0_21] : memref<72x1024xf32, #tpu.memory_space<vmem>>, vector<8x256xf32>
    tpu.vector_store %arg7[%c0_20, %c0_21], %11 {strides = array<i32>} : memref<72x1024xf32, #tpu.memory_space<vmem>>, vector<8x256xf32>,
    %c0_22 = arith.constant 0 : index
    %c1_23 = arith.constant 1 : index
    %c0_24 = arith.constant 0 : index
    %c0_25 = arith.constant 0 : index
    %13 = vector.load %arg6[%c0_22, %c1_23, %c0_24, %c0_25] : memref<2x2x8x384xf32, #tpu.memory_space<vmem>>, vector<1x1x8x256xf32>
    %14 = vector.shape_cast %13 : vector<1x1x8x256xf32> to vector<8x256xf32>
    %c0_26 = arith.constant 0 : index
    %c256 = arith.constant 256 : index
    %15 = vector.load %arg7[%c0_26, %c256] : memref<72x1024xf32, #tpu.memory_space<vmem>>, vector<8x256xf32>
    tpu.vector_store %arg7[%c0_26, %c256], %14 {strides = array<i32>} : memref<72x1024xf32, #tpu.memory_space<vmem>>, vector<8x256xf32>,
    %c1_27 = arith.constant 1 : index
    %c0_28 = arith.constant 0 : index
    %c0_29 = arith.constant 0 : index
    %c0_30 = arith.constant 0 : index
    %16 = vector.load %arg6[%c1_27, %c0_28, %c0_29, %c0_30] : memref<2x2x8x384xf32, #tpu.memory_space<vmem>>, vector<1x1x8x256xf32>
    %17 = vector.shape_cast %16 : vector<1x1x8x256xf32> to vector<8x256xf32>
    %c0_31 = arith.constant 0 : index
    %c512 = arith.constant 512 : index
    %18 = vector.load %arg7[%c0_31, %c512] : memref<72x1024xf32, #tpu.memory_space<vmem>>, vector<8x256xf32>
    tpu.vector_store %arg7[%c0_31, %c512], %17 {strides = array<i32>} : memref<72x1024xf32, #tpu.memory_space<vmem>>, vector<8x256xf32>,
    %c1_32 = arith.constant 1 : index
    %c1_33 = arith.constant 1 : index
    %c0_34 = arith.constant 0 : index
    %c0_35 = arith.constant 0 : index
    %19 = vector.load %arg6[%c1_32, %c1_33, %c0_34, %c0_35] : memref<2x2x8x384xf32, #tpu.memory_space<vmem>>, vector<1x1x8x256xf32>
    %20 = vector.shape_cast %19 : vector<1x1x8x256xf32> to vector<8x256xf32>
    %c0_36 = arith.constant 0 : index
    %c768 = arith.constant 768 : index
    %21 = vector.load %arg7[%c0_36, %c768] : memref<72x1024xf32, #tpu.memory_space<vmem>>, vector<8x256xf32>
    tpu.vector_store %arg7[%c0_36, %c768], %20 {strides = array<i32>} : memref<72x1024xf32, #tpu.memory_space<vmem>>, vector<8x256xf32>,
    %c0_37 = arith.constant 0 : index
    %c0_38 = arith.constant 0 : index
    %c0_39 = arith.constant 0 : index
    %c1_40 = arith.constant 1 : index
    %22 = vector.load %arg6[%c0_37, %c0_38, %c0_39, %c1_40] : memref<2x2x8x384xf32, #tpu.memory_space<vmem>>, vector<1x1x8x256xf32>
    %23 = vector.shape_cast %22 : vector<1x1x8x256xf32> to vector<8x256xf32>
    %c8 = arith.constant 8 : index
    %c0_41 = arith.constant 0 : index
    %24 = vector.load %arg7[%c8, %c0_41] : memref<72x1024xf32, #tpu.memory_space<vmem>>, vector<8x256xf32>
    tpu.vector_store %arg7[%c8, %c0_41], %23 {strides = array<i32>} : memref<72x1024xf32, #tpu.memory_space<vmem>>, vector<8x256xf32>,
    %c0_42 = arith.constant 0 : index
    %c1_43 = arith.constant 1 : index
    %c0_44 = arith.constant 0 : index
    %c1_45 = arith.constant 1 : index
    %25 = vector.load %arg6[%c0_42, %c1_43, %c0_44, %c1_45] : memref<2x2x8x384xf32, #tpu.memory_space<vmem>>, vector<1x1x8x256xf32>
    %26 = vector.shape_cast %25 : vector<1x1x8x256xf32> to vector<8x256xf32>
    %c8_46 = arith.constant 8 : index
    %c256_47 = arith.constant 256 : index
    %27 = vector.load %arg7[%c8_46, %c256_47] : memref<72x1024xf32, #tpu.memory_space<vmem>>, vector<8x256xf32>
    tpu.vector_store %arg7[%c8_46, %c256_47], %26 {strides = array<i32>} : memref<72x1024xf32, #tpu.memory_space<vmem>>, vector<8x256xf32>,
    %c1_48 = arith.constant 1 : index
    %c0_49 = arith.constant 0 : index
    %c0_50 = arith.constant 0 : index
    %c1_51 = arith.constant 1 : index
    %28 = vector.load %arg6[%c1_48, %c0_49, %c0_50, %c1_51] : memref<2x2x8x384xf32, #tpu.memory_space<vmem>>, vector<1x1x8x256xf32>
    %29 = vector.shape_cast %28 : vector<1x1x8x256xf32> to vector<8x256xf32>
    %c8_52 = arith.constant 8 : index
    %c512_53 = arith.constant 512 : index
    %30 = vector.load %arg7[%c8_52, %c512_53] : memref<72x1024xf32, #tpu.memory_space<vmem>>, vector<8x256xf32>
    tpu.vector_store %arg7[%c8_52, %c512_53], %29 {strides = array<i32>} : memref<72x1024xf32, #tpu.memory_space<vmem>>, vector<8x256xf32>,
    %c1_54 = arith.constant 1 : index
    %c1_55 = arith.constant 1 : index
    %c0_56 = arith.constant 0 : index
    %c1_57 = arith.constant 1 : index
    %31 = vector.load %arg6[%c1_54, %c1_55, %c0_56, %c1_57] : memref<2x2x8x384xf32, #tpu.memory_space<vmem>>, vector<1x1x8x256xf32>
    %32 = vector.shape_cast %31 : vector<1x1x8x256xf32> to vector<8x256xf32>
    %c8_58 = arith.constant 8 : index
    %c768_59 = arith.constant 768 : index
    %33 = vector.load %arg7[%c8_58, %c768_59] : memref<72x1024xf32, #tpu.memory_space<vmem>>, vector<8x256xf32>
    tpu.vector_store %arg7[%c8_58, %c768_59], %32 {strides = array<i32>} : memref<72x1024xf32, #tpu.memory_space<vmem>>, vector<8x256xf32>,
    %c0_60 = arith.constant 0 : index
    %c0_61 = arith.constant 0 : index
    %c0_62 = arith.constant 0 : index
    %c2 = arith.constant 2 : index
    %34 = vector.load %arg6[%c0_60, %c0_61, %c0_62, %c2] : memref<2x2x8x384xf32, #tpu.memory_space<vmem>>, vector<1x1x8x256xf32>
    %35 = vector.shape_cast %34 : vector<1x1x8x256xf32> to vector<8x256xf32>
    %c16 = arith.constant 16 : index
    %c0_63 = arith.constant 0 : index
    %36 = vector.load %arg7[%c16, %c0_63] : memref<72x1024xf32, #tpu.memory_space<vmem>>, vector<8x256xf32>
    tpu.vector_store %arg7[%c16, %c0_63], %35 {strides = array<i32>} : memref<72x1024xf32, #tpu.memory_space<vmem>>, vector<8x256xf32>,
    %c0_64 = arith.constant 0 : index
    %c1_65 = arith.constant 1 : index
    %c0_66 = arith.constant 0 : index
    %c2_67 = arith.constant 2 : index
    %37 = vector.load %arg6[%c0_64, %c1_65, %c0_66, %c2_67] : memref<2x2x8x384xf32, #tpu.memory_space<vmem>>, vector<1x1x8x256xf32>
    %38 = vector.shape_cast %37 : vector<1x1x8x256xf32> to vector<8x256xf32>
    %c16_68 = arith.constant 16 : index
    %c256_69 = arith.constant 256 : index
    %39 = vector.load %arg7[%c16_68, %c256_69] : memref<72x1024xf32, #tpu.memory_space<vmem>>, vector<8x256xf32>
    tpu.vector_store %arg7[%c16_68, %c256_69], %38 {strides = array<i32>} : memref<72x1024xf32, #tpu.memory_space<vmem>>, vector<8x256xf32>,
    %c1_70 = arith.constant 1 : index
    %c0_71 = arith.constant 0 : index
    %c0_72 = arith.constant 0 : index
    %c2_73 = arith.constant 2 : index
    %40 = vector.load %arg6[%c1_70, %c0_71, %c0_72, %c2_73] : memref<2x2x8x384xf32, #tpu.memory_space<vmem>>, vector<1x1x8x256xf32>
    %41 = vector.shape_cast %40 : vector<1x1x8x256xf32> to vector<8x256xf32>
    %c16_74 = arith.constant 16 : index
    %c512_75 = arith.constant 512 : index
    %42 = vector.load %arg7[%c16_74, %c512_75] : memref<72x1024xf32, #tpu.memory_space<vmem>>, vector<8x256xf32>
    tpu.vector_store %arg7[%c16_74, %c512_75], %41 {strides = array<i32>} : memref<72x1024xf32, #tpu.memory_space<vmem>>, vector<8x256xf32>,
    %c1_76 = arith.constant 1 : index
    %c1_77 = arith.constant 1 : index
    %c0_78 = arith.constant 0 : index
    %c2_79 = arith.constant 2 : index
    %43 = vector.load %arg6[%c1_76, %c1_77, %c0_78, %c2_79] : memref<2x2x8x384xf32, #tpu.memory_space<vmem>>, vector<1x1x8x256xf32>
    %44 = vector.shape_cast %43 : vector<1x1x8x256xf32> to vector<8x256xf32>
    %c16_80 = arith.constant 16 : index
    %c768_81 = arith.constant 768 : index
    %45 = vector.load %arg7[%c16_80, %c768_81] : memref<72x1024xf32, #tpu.memory_space<vmem>>, vector<8x256xf32>
    tpu.vector_store %arg7[%c16_80, %c768_81], %44 {strides = array<i32>} : memref<72x1024xf32, #tpu.memory_space<vmem>>, vector<8x256xf32>,
    %c0_82 = arith.constant 0 : index
    %c0_83 = arith.constant 0 : index
    %c0_84 = arith.constant 0 : index
    %c16_85 = arith.constant 16 : index
    %46 = vector.load %arg6[%c0_82, %c0_83, %c0_84, %c16_85] : memref<2x2x8x384xf32, #tpu.memory_space<vmem>>, vector<1x1x8x256xf32>
    %47 = vector.shape_cast %46 : vector<1x1x8x256xf32> to vector<8x256xf32>
    %c24 = arith.constant 24 : index
    %c0_86 = arith.constant 0 : index
    %48 = vector.load %arg7[%c24, %c0_86] : memref<72x1024xf32, #tpu.memory_space<vmem>>, vector<8x256xf32>
    tpu.vector_store %arg7[%c24, %c0_86], %47 {strides = array<i32>} : memref<72x1024xf32, #tpu.memory_space<vmem>>, vector<8x256xf32>,
    %c0_87 = arith.constant 0 : index
    %c1_88 = arith.constant 1 : index
    %c0_89 = arith.constant 0 : index
    %c16_90 = arith.constant 16 : index
    %49 = vector.load %arg6[%c0_87, %c1_88, %c0_89, %c16_90] : memref<2x2x8x384xf32, #tpu.memory_space<vmem>>, vector<1x1x8x256xf32>
    %50 = vector.shape_cast %49 : vector<1x1x8x256xf32> to vector<8x256xf32>
    %c24_91 = arith.constant 24 : index
    %c256_92 = arith.constant 256 : index
    %51 = vector.load %arg7[%c24_91, %c256_92] : memref<72x1024xf32, #tpu.memory_space<vmem>>, vector<8x256xf32>
    tpu.vector_store %arg7[%c24_91, %c256_92], %50 {strides = array<i32>} : memref<72x1024xf32, #tpu.memory_space<vmem>>, vector<8x256xf32>,
    %c1_93 = arith.constant 1 : index
    %c0_94 = arith.constant 0 : index
    %c0_95 = arith.constant 0 : index
    %c16_96 = arith.constant 16 : index
    %52 = vector.load %arg6[%c1_93, %c0_94, %c0_95, %c16_96] : memref<2x2x8x384xf32, #tpu.memory_space<vmem>>, vector<1x1x8x256xf32>
    %53 = vector.shape_cast %52 : vector<1x1x8x256xf32> to vector<8x256xf32>
    %c24_97 = arith.constant 24 : index
    %c512_98 = arith.constant 512 : index
    %54 = vector.load %arg7[%c24_97, %c512_98] : memref<72x1024xf32, #tpu.memory_space<vmem>>, vector<8x256xf32>
    tpu.vector_store %arg7[%c24_97, %c512_98], %53 {strides = array<i32>} : memref<72x1024xf32, #tpu.memory_space<vmem>>, vector<8x256xf32>,
    %c1_99 = arith.constant 1 : index
    %c1_100 = arith.constant 1 : index
    %c0_101 = arith.constant 0 : index
    %c16_102 = arith.constant 16 : index
    %55 = vector.load %arg6[%c1_99, %c1_100, %c0_101, %c16_102] : memref<2x2x8x384xf32, #tpu.memory_space<vmem>>, vector<1x1x8x256xf32>
    %56 = vector.shape_cast %55 : vector<1x1x8x256xf32> to vector<8x256xf32>
    %c24_103 = arith.constant 24 : index
    %c768_104 = arith.constant 768 : index
    %57 = vector.load %arg7[%c24_103, %c768_104] : memref<72x1024xf32, #tpu.memory_space<vmem>>, vector<8x256xf32>
    tpu.vector_store %arg7[%c24_103, %c768_104], %56 {strides = array<i32>} : memref<72x1024xf32, #tpu.memory_space<vmem>>, vector<8x256xf32>,
    %c0_105 = arith.constant 0 : index
    %c0_106 = arith.constant 0 : index
    %c0_107 = arith.constant 0 : index
    %c17 = arith.constant 17 : index
    %58 = vector.load %arg6[%c0_105, %c0_106, %c0_107, %c17] : memref<2x2x8x384xf32, #tpu.memory_space<vmem>>, vector<1x1x8x256xf32>
    %59 = vector.shape_cast %58 : vector<1x1x8x256xf32> to vector<8x256xf32>
    %c32 = arith.constant 32 : index
    %c0_108 = arith.constant 0 : index
    %60 = vector.load %arg7[%c32, %c0_108] : memref<72x1024xf32, #tpu.memory_space<vmem>>, vector<8x256xf32>
    tpu.vector_store %arg7[%c32, %c0_108], %59 {strides = array<i32>} : memref<72x1024xf32, #tpu.memory_space<vmem>>, vector<8x256xf32>,
    %c0_109 = arith.constant 0 : index
    %c1_110 = arith.constant 1 : index
    %c0_111 = arith.constant 0 : index
    %c17_112 = arith.constant 17 : index
    %61 = vector.load %arg6[%c0_109, %c1_110, %c0_111, %c17_112] : memref<2x2x8x384xf32, #tpu.memory_space<vmem>>, vector<1x1x8x256xf32>
    %62 = vector.shape_cast %61 : vector<1x1x8x256xf32> to vector<8x256xf32>
    %c32_113 = arith.constant 32 : index
    %c256_114 = arith.constant 256 : index
    %63 = vector.load %arg7[%c32_113, %c256_114] : memref<72x1024xf32, #tpu.memory_space<vmem>>, vector<8x256xf32>
    tpu.vector_store %arg7[%c32_113, %c256_114], %62 {strides = array<i32>} : memref<72x1024xf32, #tpu.memory_space<vmem>>, vector<8x256xf32>,
    %c1_115 = arith.constant 1 : index
    %c0_116 = arith.constant 0 : index
    %c0_117 = arith.constant 0 : index
    %c17_118 = arith.constant 17 : index
    %64 = vector.load %arg6[%c1_115, %c0_116, %c0_117, %c17_118] : memref<2x2x8x384xf32, #tpu.memory_space<vmem>>, vector<1x1x8x256xf32>
    %65 = vector.shape_cast %64 : vector<1x1x8x256xf32> to vector<8x256xf32>
    %c32_119 = arith.constant 32 : index
    %c512_120 = arith.constant 512 : index
    %66 = vector.load %arg7[%c32_119, %c512_120] : memref<72x1024xf32, #tpu.memory_space<vmem>>, vector<8x256xf32>
    tpu.vector_store %arg7[%c32_119, %c512_120], %65 {strides = array<i32>} : memref<72x1024xf32, #tpu.memory_space<vmem>>, vector<8x256xf32>,
    %c1_121 = arith.constant 1 : index
    %c1_122 = arith.constant 1 : index
    %c0_123 = arith.constant 0 : index
    %c17_124 = arith.constant 17 : index
    %67 = vector.load %arg6[%c1_121, %c1_122, %c0_123, %c17_124] : memref<2x2x8x384xf32, #tpu.memory_space<vmem>>, vector<1x1x8x256xf32>
    %68 = vector.shape_cast %67 : vector<1x1x8x256xf32> to vector<8x256xf32>
    %c32_125 = arith.constant 32 : index
    %c768_126 = arith.constant 768 : index
    %69 = vector.load %arg7[%c32_125, %c768_126] : memref<72x1024xf32, #tpu.memory_space<vmem>>, vector<8x256xf32>
    tpu.vector_store %arg7[%c32_125, %c768_126], %68 {strides = array<i32>} : memref<72x1024xf32, #tpu.memory_space<vmem>>, vector<8x256xf32>,
    %c0_127 = arith.constant 0 : index
    %c0_128 = arith.constant 0 : index
    %c0_129 = arith.constant 0 : index
    %c18 = arith.constant 18 : index
    %70 = vector.load %arg6[%c0_127, %c0_128, %c0_129, %c18] : memref<2x2x8x384xf32, #tpu.memory_space<vmem>>, vector<1x1x8x256xf32>
    %71 = vector.shape_cast %70 : vector<1x1x8x256xf32> to vector<8x256xf32>
    %c40 = arith.constant 40 : index
    %c0_130 = arith.constant 0 : index
    %72 = vector.load %arg7[%c40, %c0_130] : memref<72x1024xf32, #tpu.memory_space<vmem>>, vector<8x256xf32>
    tpu.vector_store %arg7[%c40, %c0_130], %71 {strides = array<i32>} : memref<72x1024xf32, #tpu.memory_space<vmem>>, vector<8x256xf32>,
    %c0_131 = arith.constant 0 : index
    %c1_132 = arith.constant 1 : index
    %c0_133 = arith.constant 0 : index
    %c18_134 = arith.constant 18 : index
    %73 = vector.load %arg6[%c0_131, %c1_132, %c0_133, %c18_134] : memref<2x2x8x384xf32, #tpu.memory_space<vmem>>, vector<1x1x8x256xf32>
    %74 = vector.shape_cast %73 : vector<1x1x8x256xf32> to vector<8x256xf32>
    %c40_135 = arith.constant 40 : index
    %c256_136 = arith.constant 256 : index
    %75 = vector.load %arg7[%c40_135, %c256_136] : memref<72x1024xf32, #tpu.memory_space<vmem>>, vector<8x256xf32>
    tpu.vector_store %arg7[%c40_135, %c256_136], %74 {strides = array<i32>} : memref<72x1024xf32, #tpu.memory_space<vmem>>, vector<8x256xf32>,
    %c1_137 = arith.constant 1 : index
    %c0_138 = arith.constant 0 : index
    %c0_139 = arith.constant 0 : index
    %c18_140 = arith.constant 18 : index
    %76 = vector.load %arg6[%c1_137, %c0_138, %c0_139, %c18_140] : memref<2x2x8x384xf32, #tpu.memory_space<vmem>>, vector<1x1x8x256xf32>
    %77 = vector.shape_cast %76 : vector<1x1x8x256xf32> to vector<8x256xf32>
    %c40_141 = arith.constant 40 : index
    %c512_142 = arith.constant 512 : index
    %78 = vector.load %arg7[%c40_141, %c512_142] : memref<72x1024xf32, #tpu.memory_space<vmem>>, vector<8x256xf32>
    tpu.vector_store %arg7[%c40_141, %c512_142], %77 {strides = array<i32>} : memref<72x1024xf32, #tpu.memory_space<vmem>>, vector<8x256xf32>,
    %c1_143 = arith.constant 1 : index
    %c1_144 = arith.constant 1 : index
    %c0_145 = arith.constant 0 : index
    %c18_146 = arith.constant 18 : index
    %79 = vector.load %arg6[%c1_143, %c1_144, %c0_145, %c18_146] : memref<2x2x8x384xf32, #tpu.memory_space<vmem>>, vector<1x1x8x256xf32>
    %80 = vector.shape_cast %79 : vector<1x1x8x256xf32> to vector<8x256xf32>
    %c40_147 = arith.constant 40 : index
    %c768_148 = arith.constant 768 : index
    %81 = vector.load %arg7[%c40_147, %c768_148] : memref<72x1024xf32, #tpu.memory_space<vmem>>, vector<8x256xf32>
    tpu.vector_store %arg7[%c40_147, %c768_148], %80 {strides = array<i32>} : memref<72x1024xf32, #tpu.memory_space<vmem>>, vector<8x256xf32>,
    %c0_149 = arith.constant 0 : index
    %c0_150 = arith.constant 0 : index
    %c0_151 = arith.constant 0 : index
    %c32_152 = arith.constant 32 : index
    %82 = vector.load %arg6[%c0_149, %c0_150, %c0_151, %c32_152] : memref<2x2x8x384xf32, #tpu.memory_space<vmem>>, vector<1x1x8x256xf32>
    %83 = vector.shape_cast %82 : vector<1x1x8x256xf32> to vector<8x256xf32>
    %c48 = arith.constant 48 : index
    %c0_153 = arith.constant 0 : index
    %84 = vector.load %arg7[%c48, %c0_153] : memref<72x1024xf32, #tpu.memory_space<vmem>>, vector<8x256xf32>
    tpu.vector_store %arg7[%c48, %c0_153], %83 {strides = array<i32>} : memref<72x1024xf32, #tpu.memory_space<vmem>>, vector<8x256xf32>,
    %c0_154 = arith.constant 0 : index
    %c1_155 = arith.constant 1 : index
    %c0_156 = arith.constant 0 : index
    %c32_157 = arith.constant 32 : index
    %85 = vector.load %arg6[%c0_154, %c1_155, %c0_156, %c32_157] : memref<2x2x8x384xf32, #tpu.memory_space<vmem>>, vector<1x1x8x256xf32>
    %86 = vector.shape_cast %85 : vector<1x1x8x256xf32> to vector<8x256xf32>
    %c48_158 = arith.constant 48 : index
    %c256_159 = arith.constant 256 : index
    %87 = vector.load %arg7[%c48_158, %c256_159] : memref<72x1024xf32, #tpu.memory_space<vmem>>, vector<8x256xf32>
    tpu.vector_store %arg7[%c48_158, %c256_159], %86 {strides = array<i32>} : memref<72x1024xf32, #tpu.memory_space<vmem>>, vector<8x256xf32>,
    %c1_160 = arith.constant 1 : index
    %c0_161 = arith.constant 0 : index
    %c0_162 = arith.constant 0 : index
    %c32_163 = arith.constant 32 : index
    %88 = vector.load %arg6[%c1_160, %c0_161, %c0_162, %c32_163] : memref<2x2x8x384xf32, #tpu.memory_space<vmem>>, vector<1x1x8x256xf32>
    %89 = vector.shape_cast %88 : vector<1x1x8x256xf32> to vector<8x256xf32>
    %c48_164 = arith.constant 48 : index
    %c512_165 = arith.constant 512 : index
    %90 = vector.load %arg7[%c48_164, %c512_165] : memref<72x1024xf32, #tpu.memory_space<vmem>>, vector<8x256xf32>
    tpu.vector_store %arg7[%c48_164, %c512_165], %89 {strides = array<i32>} : memref<72x1024xf32, #tpu.memory_space<vmem>>, vector<8x256xf32>,
    %c1_166 = arith.constant 1 : index
    %c1_167 = arith.constant 1 : index
    %c0_168 = arith.constant 0 : index
    %c32_169 = arith.constant 32 : index
    %91 = vector.load %arg6[%c1_166, %c1_167, %c0_168, %c32_169] : memref<2x2x8x384xf32, #tpu.memory_space<vmem>>, vector<1x1x8x256xf32>
    %92 = vector.shape_cast %91 : vector<1x1x8x256xf32> to vector<8x256xf32>
    %c48_170 = arith.constant 48 : index
    %c768_171 = arith.constant 768 : index
    %93 = vector.load %arg7[%c48_170, %c768_171] : memref<72x1024xf32, #tpu.memory_space<vmem>>, vector<8x256xf32>
    tpu.vector_store %arg7[%c48_170, %c768_171], %92 {strides = array<i32>} : memref<72x1024xf32, #tpu.memory_space<vmem>>, vector<8x256xf32>,
    %c0_172 = arith.constant 0 : index
    %c0_173 = arith.constant 0 : index
    %c0_174 = arith.constant 0 : index
    %c33 = arith.constant 33 : index
    %94 = vector.load %arg6[%c0_172, %c0_173, %c0_174, %c33] : memref<2x2x8x384xf32, #tpu.memory_space<vmem>>, vector<1x1x8x256xf32>
    %95 = vector.shape_cast %94 : vector<1x1x8x256xf32> to vector<8x256xf32>
    %c56 = arith.constant 56 : index
    %c0_175 = arith.constant 0 : index
    %96 = vector.load %arg7[%c56, %c0_175] : memref<72x1024xf32, #tpu.memory_space<vmem>>, vector<8x256xf32>
    tpu.vector_store %arg7[%c56, %c0_175], %95 {strides = array<i32>} : memref<72x1024xf32, #tpu.memory_space<vmem>>, vector<8x256xf32>,
    %c0_176 = arith.constant 0 : index
    %c1_177 = arith.constant 1 : index
    %c0_178 = arith.constant 0 : index
    %c33_179 = arith.constant 33 : index
    %97 = vector.load %arg6[%c0_176, %c1_177, %c0_178, %c33_179] : memref<2x2x8x384xf32, #tpu.memory_space<vmem>>, vector<1x1x8x256xf32>
    %98 = vector.shape_cast %97 : vector<1x1x8x256xf32> to vector<8x256xf32>
    %c56_180 = arith.constant 56 : index
    %c256_181 = arith.constant 256 : index
    %99 = vector.load %arg7[%c56_180, %c256_181] : memref<72x1024xf32, #tpu.memory_space<vmem>>, vector<8x256xf32>
    tpu.vector_store %arg7[%c56_180, %c256_181], %98 {strides = array<i32>} : memref<72x1024xf32, #tpu.memory_space<vmem>>, vector<8x256xf32>,
    %c1_182 = arith.constant 1 : index
    %c0_183 = arith.constant 0 : index
    %c0_184 = arith.constant 0 : index
    %c33_185 = arith.constant 33 : index
    %100 = vector.load %arg6[%c1_182, %c0_183, %c0_184, %c33_185] : memref<2x2x8x384xf32, #tpu.memory_space<vmem>>, vector<1x1x8x256xf32>
    %101 = vector.shape_cast %100 : vector<1x1x8x256xf32> to vector<8x256xf32>
    %c56_186 = arith.constant 56 : index
    %c512_187 = arith.constant 512 : index
    %102 = vector.load %arg7[%c56_186, %c512_187] : memref<72x1024xf32, #tpu.memory_space<vmem>>, vector<8x256xf32>
    tpu.vector_store %arg7[%c56_186, %c512_187], %101 {strides = array<i32>} : memref<72x1024xf32, #tpu.memory_space<vmem>>, vector<8x256xf32>,
    %c1_188 = arith.constant 1 : index
    %c1_189 = arith.constant 1 : index
    %c0_190 = arith.constant 0 : index
    %c33_191 = arith.constant 33 : index
    %103 = vector.load %arg6[%c1_188, %c1_189, %c0_190, %c33_191] : memref<2x2x8x384xf32, #tpu.memory_space<vmem>>, vector<1x1x8x256xf32>
    %104 = vector.shape_cast %103 : vector<1x1x8x256xf32> to vector<8x256xf32>
    %c56_192 = arith.constant 56 : index
    %c768_193 = arith.constant 768 : index
    %105 = vector.load %arg7[%c56_192, %c768_193] : memref<72x1024xf32, #tpu.memory_space<vmem>>, vector<8x256xf32>
    tpu.vector_store %arg7[%c56_192, %c768_193], %104 {strides = array<i32>} : memref<72x1024xf32, #tpu.memory_space<vmem>>, vector<8x256xf32>,
    %c0_194 = arith.constant 0 : index
    %c0_195 = arith.constant 0 : index
    %c0_196 = arith.constant 0 : index
    %c34 = arith.constant 34 : index
    %106 = vector.load %arg6[%c0_194, %c0_195, %c0_196, %c34] : memref<2x2x8x384xf32, #tpu.memory_space<vmem>>, vector<1x1x8x256xf32>
    %107 = vector.shape_cast %106 : vector<1x1x8x256xf32> to vector<8x256xf32>
    %c64 = arith.constant 64 : index
    %c0_197 = arith.constant 0 : index
    %108 = vector.load %arg7[%c64, %c0_197] : memref<72x1024xf32, #tpu.memory_space<vmem>>, vector<8x256xf32>
    tpu.vector_store %arg7[%c64, %c0_197], %107 {strides = array<i32>} : memref<72x1024xf32, #tpu.memory_space<vmem>>, vector<8x256xf32>,
    %c0_198 = arith.constant 0 : index
    %c1_199 = arith.constant 1 : index
    %c0_200 = arith.constant 0 : index
    %c34_201 = arith.constant 34 : index
    %109 = vector.load %arg6[%c0_198, %c1_199, %c0_200, %c34_201] : memref<2x2x8x384xf32, #tpu.memory_space<vmem>>, vector<1x1x8x256xf32>
    %110 = vector.shape_cast %109 : vector<1x1x8x256xf32> to vector<8x256xf32>
    %c64_202 = arith.constant 64 : index
    %c256_203 = arith.constant 256 : index
    %111 = vector.load %arg7[%c64_202, %c256_203] : memref<72x1024xf32, #tpu.memory_space<vmem>>, vector<8x256xf32>
    tpu.vector_store %arg7[%c64_202, %c256_203], %110 {strides = array<i32>} : memref<72x1024xf32, #tpu.memory_space<vmem>>, vector<8x256xf32>,
    %c1_204 = arith.constant 1 : index
    %c0_205 = arith.constant 0 : index
    %c0_206 = arith.constant 0 : index
    %c34_207 = arith.constant 34 : index
    %112 = vector.load %arg6[%c1_204, %c0_205, %c0_206, %c34_207] : memref<2x2x8x384xf32, #tpu.memory_space<vmem>>, vector<1x1x8x256xf32>
    %113 = vector.shape_cast %112 : vector<1x1x8x256xf32> to vector<8x256xf32>
    %c64_208 = arith.constant 64 : index
    %c512_209 = arith.constant 512 : index
    %114 = vector.load %arg7[%c64_208, %c512_209] : memref<72x1024xf32, #tpu.memory_space<vmem>>, vector<8x256xf32>
    tpu.vector_store %arg7[%c64_208, %c512_209], %113 {strides = array<i32>} : memref<72x1024xf32, #tpu.memory_space<vmem>>, vector<8x256xf32>,
    %c1_210 = arith.constant 1 : index
    %c1_211 = arith.constant 1 : index
    %c0_212 = arith.constant 0 : index
    %c34_213 = arith.constant 34 : index
    %115 = vector.load %arg6[%c1_210, %c1_211, %c0_212, %c34_213] : memref<2x2x8x384xf32, #tpu.memory_space<vmem>>, vector<1x1x8x256xf32>
    %116 = vector.shape_cast %115 : vector<1x1x8x256xf32> to vector<8x256xf32>
    %c64_214 = arith.constant 64 : index
    %c768_215 = arith.constant 768 : index
    %117 = vector.load %arg7[%c64_214, %c768_215] : memref<72x1024xf32, #tpu.memory_space<vmem>>, vector<8x256xf32>
    tpu.vector_store %arg7[%c64_214, %c768_215], %116 {strides = array<i32>} : memref<72x1024xf32, #tpu.memory_space<vmem>>, vector<8x256xf32>,
    %c0_216 = arith.constant 0 : index
    %c0_217 = arith.constant 0 : index
    %118 = vector.load %arg3[%c0_216, %c0_217] : memref<8x72xf32, #tpu.memory_space<vmem>>, vector<8x72xf32>
    %c0_218 = arith.constant 0 : index
    %c0_219 = arith.constant 0 : index
    %119 = vector.load %arg7[%c0_218, %c0_219] : memref<72x1024xf32, #tpu.memory_space<vmem>>, vector<72x1024xf32>
    %cst_220 = arith.constant dense<0.000000e+00> : vector<8x1024xf32>
    %120 = tpu.matmul %118, %119, %cst_220 {dimension_numbers = #tpu.dot_dimension_numbers<[1], [0], [0], [1], [0, 0, 1, 1], [], []>} : vector<8x72xf32>, vector<72x1024xf32>, vector<8x1024xf32> -> vector<8x1024xf32>
    %121 = vector.extract_strided_slice %120 {offsets = [0, 0], sizes = [8, 256], strides = [1, 1]} : vector<8x1024xf32> to vector<8x256xf32>
    %c0_221 = arith.constant 0 : index
    %c0_222 = arith.constant 0 : index
    %c0_223 = arith.constant 0 : index
    %122 = vector.load %arg4[%c0_221, %c0_222, %c0_223] : memref<2x8x256xf32, #tpu.memory_space<vmem>>, vector<1x8x256xf32>
    %123 = vector.shape_cast %122 : vector<1x8x256xf32> to vector<8x256xf32>
    %124 = vector.shape_cast %121 : vector<8x256xf32> to vector<1x8x256xf32>
    tpu.vector_store %arg4[%c0_221, %c0_222, %c0_223], %124 {strides = array<i32>} : memref<2x8x256xf32, #tpu.memory_space<vmem>>, vector<1x8x256xf32>,
    %125 = vector.extract_strided_slice %120 {offsets = [0, 512], sizes = [8, 256], strides = [1, 1]} : vector<8x1024xf32> to vector<8x256xf32>
    %c0_224 = arith.constant 0 : index
    %c0_225 = arith.constant 0 : index
    %c0_226 = arith.constant 0 : index
    %126 = vector.load %arg5[%c0_224, %c0_225, %c0_226] : memref<2x8x256xf32, #tpu.memory_space<vmem>>, vector<1x8x256xf32>
    %127 = vector.shape_cast %126 : vector<1x8x256xf32> to vector<8x256xf32>
    %128 = vector.shape_cast %125 : vector<8x256xf32> to vector<1x8x256xf32>
    tpu.vector_store %arg5[%c0_224, %c0_225, %c0_226], %128 {strides = array<i32>} : memref<2x8x256xf32, #tpu.memory_space<vmem>>, vector<1x8x256xf32>,
    %129 = vector.extract_strided_slice %120 {offsets = [0, 256], sizes = [8, 256], strides = [1, 1]} : vector<8x1024xf32> to vector<8x256xf32>
    %c1_227 = arith.constant 1 : index
    %c0_228 = arith.constant 0 : index
    %c0_229 = arith.constant 0 : index
    %130 = vector.load %arg4[%c1_227, %c0_228, %c0_229] : memref<2x8x256xf32, #tpu.memory_space<vmem>>, vector<1x8x256xf32>
    %131 = vector.shape_cast %130 : vector<1x8x256xf32> to vector<8x256xf32>
    %132 = vector.shape_cast %129 : vector<8x256xf32> to vector<1x8x256xf32>
    tpu.vector_store %arg4[%c1_227, %c0_228, %c0_229], %132 {strides = array<i32>} : memref<2x8x256xf32, #tpu.memory_space<vmem>>, vector<1x8x256xf32>,
    %133 = vector.extract_strided_slice %120 {offsets = [0, 768], sizes = [8, 256], strides = [1, 1]} : vector<8x1024xf32> to vector<8x256xf32>
    %c1_230 = arith.constant 1 : index
    %c0_231 = arith.constant 0 : index
    %c0_232 = arith.constant 0 : index
    %134 = vector.load %arg5[%c1_230, %c0_231, %c0_232] : memref<2x8x256xf32, #tpu.memory_space<vmem>>, vector<1x8x256xf32>
    %135 = vector.shape_cast %134 : vector<1x8x256xf32> to vector<8x256xf32>
    %136 = vector.shape_cast %133 : vector<8x256xf32> to vector<1x8x256xf32>
    tpu.vector_store %arg5[%c1_230, %c0_231, %c0_232], %136 {strides = array<i32>} : memref<2x8x256xf32, #tpu.memory_space<vmem>>, vector<1x8x256xf32>,
    return
  }
  func.func @transform_0(%arg0: i32) -> (i32, i32, i32) {
    %c0_i32 = arith.constant 0 : i32
    %c0_i32_0 = arith.constant 0 : i32
    %c0_i32_1 = arith.constant 0 : i32
    return %arg0, %c0_i32, %c0_i32_0 : i32, i32, i32
  }
  func.func @transform_1(%arg0: i32) -> (i32, i32, i32) {
    %c0_i32 = arith.constant 0 : i32
    %c0_i32_0 = arith.constant 0 : i32
    %c0_i32_1 = arith.constant 0 : i32
    return %arg0, %c0_i32, %c0_i32_0 : i32, i32, i32
  }
  func.func @transform_2(%arg0: i32) -> (i32, i32) {
    %c0_i32 = arith.constant 0 : i32
    %c0_i32_0 = arith.constant 0 : i32
    %c0_i32_1 = arith.constant 0 : i32
    return %c0_i32, %c0_i32_0 : i32, i32
  }
  func.func @transform_3(%arg0: i32) -> (i32, i32, i32) {
    %c0_i32 = arith.constant 0 : i32
    %c0_i32_0 = arith.constant 0 : i32
    %c0_i32_1 = arith.constant 0 : i32
    return %arg0, %c0_i32, %c0_i32_0 : i32, i32, i32
  }
  func.func @transform_4(%arg0: i32) -> (i32, i32, i32) {
    %c0_i32 = arith.constant 0 : i32
    %c0_i32_0 = arith.constant 0 : i32
    %c0_i32_1 = arith.constant 0 : i32
    return %arg0, %c0_i32, %c0_i32_0 : i32, i32, i32
  }
}

</mosaic_0001>

<bundles_post_ra>
// kernel: custom-call.1
= control target key start
LH: loop header
LB: loop body
LE: loop exit
PB: predicated region body
PF: predicated region fallthrough
CT: control target
= control target key end

     0   :  { %s51_s0 = inlined_call_operand.hbm [shape: c64[2,4,16,16], index: 0, kind: input, shape index: {}]   ;;  %s52_s1 = inlined_call_operand.vmem [shape: f32[2,4,16,16], index: 1, kind: output, shape index: {}]  }
   0x1   :  { %s2_s8 = scalar_lea.hbm %s51_s0, 2048 }
   0x2   :  { %3 = vsyncpa [#allocation0], 0  ;;  %s4_s11 = sshll.u32 %s52_s1, 4  ;;  %s5_s11 = int_to_ptr.vmem [resolvable:$true] %s4_s11 }
   0x3   :  { %s20_s12 = scalar_lea.vmem %s5_s11, 2048  ;;  %p25_p1 = scmp.lt.s32.totalorder %s5_s11, %s5_s11 }
   0x4   :  { %p21_p0 = scmp.ne.s32.totalorder %s5_s11, %s20_s12  ;;  %p26_p2 = scmp.lt.s32.totalorder %s20_s12, %s20_s12 }
   0x6   :  { %p27_p3 = por %p26_p2, %p25_p1 }
   0x8   :  { %p28_p4 = pnand %p27_p3, %p21_p0 }
   0xa   :  { %31 = shalt.err (!%p28_p4)  }
   0xb   :  { %7 = dma.hbm_to_vmem [thread:$0]  %s2_s8, 2048, %s5_s11, [#allocation0] }
   0xc   :  { %33 = dma.done.wait [#allocation0], 2048  }
   0xd   :  { %34 = vsyncadd [#allocation0], 4294965248 }
   0xe   :  { %9 = vsyncpa [#allocation0], 1 }

// kernel: custom-call
= control target key start
LH: loop header
LB: loop body
LE: loop exit
PB: predicated region body
PF: predicated region fallthrough
CT: control target
= control target key end

     0   :  { %2 = vsyncpa [#allocation0], 0  ;;  %s47_s0 = inlined_call_operand.hbm [shape: c64[2,4,16,16], index: 0, kind: input, shape index: {}]   ;;  %s48_s1 = inlined_call_operand.vmem [shape: f32[2,4,16,16], index: 1, kind: output, shape index: {}]  }
   0x1   :  { %s3_s8 = sshll.u32 %s48_s1, 4  ;;  %s4_s8 = int_to_ptr.vmem [resolvable:$true] %s3_s8 }
   0x2   :  { %s17_s9 = scalar_lea.vmem %s4_s8, 2048  ;;  %p22_p1 = scmp.lt.s32.totalorder %s4_s8, %s4_s8 }
   0x3   :  { %p18_p0 = scmp.ne.s32.totalorder %s4_s8, %s17_s9  ;;  %p23_p2 = scmp.lt.s32.totalorder %s17_s9, %s17_s9 }
   0x5   :  { %p24_p3 = por %p23_p2, %p22_p1 }
   0x7   :  { %p25_p4 = pnand %p24_p3, %p18_p0 }
   0x9   :  { %28 = shalt.err (!%p25_p4)  }
   0xa   :  { %6 = dma.hbm_to_vmem [thread:$0]  %s47_s0, 2048, %s4_s8, [#allocation0] }
   0xb   :  { %29 = dma.done.wait [#allocation0], 2048  }
   0xc   :  { %30 = vsyncadd [#allocation0], 4294965248 }
   0xd   :  { %8 = vsyncpa [#allocation0], 1 }

// kernel: custom-call.2
= control target key start
LH: loop header
LB: loop body
LE: loop exit
PB: predicated region body
PF: predicated region fallthrough
CT: control target
= control target key end

     0   :  { %s92_s0 = inlined_call_operand.vmem [shape: f32[2,8,14,14], index: 0, kind: input, shape index: {}]   ;;  %s93_s1 = inlined_call_operand.vmem [shape: f32[2,8,14,14], index: 1, kind: input, shape index: {}]   ;;  %s94_s2 = inlined_call_operand.hbm [shape: c64[2,8,14,14], index: 2, kind: output, shape index: {}]  }
   0x1   :  { %s3_s11 = scalar_lea.hbm %s94_s2, 3584 }
   0x2   :  { %4 = vsyncpa [#allocation0], 0  ;;  %s5_s14 = sshll.u32 %s92_s0, 4  ;;  %s6_s14 = int_to_ptr.vmem [resolvable:$true] %s5_s14 }
   0x3   :  { %s18_s15 = scalar_lea.vmem %s6_s14, 3584  ;;  %p23_p1 = scmp.lt.s32.totalorder %s6_s14, %s6_s14 }
   0x4   :  { %p19_p0 = scmp.ne.s32.totalorder %s6_s14, %s18_s15  ;;  %p24_p2 = scmp.lt.s32.totalorder %s18_s15, %s18_s15 }
   0x6   :  { %p25_p3 = por %p24_p2, %p23_p1 }
   0x8   :  { %p26_p4 = pnand %p25_p3, %p19_p0 }
   0xa   :  { %29 = shalt.err (!%p26_p4)  }
   0xb   :  { %8 = dma.vmem_to_hbm [thread:$0]  %s6_s14, 3584, %s94_s2, [#allocation0] }
   0xc   :  { %61 = dma.done.wait [#allocation0], 3584  }
   0xd   :  { %62 = vsyncadd [#allocation0], 4294963712 }
   0xe   :  { %10 = vsyncpa [#allocation0], 1 }
   0xf   :  { %11 = vsyncpa [#allocation1], 0  ;;  %s12_s0 = sshll.u32 %s93_s1, 4  ;;  %s13_s0 = int_to_ptr.vmem [resolvable:$true] %s12_s0 }
  0x10   :  { %s38_s20 = scalar_lea.vmem %s13_s0, 3584  ;;  %p43_p6 = scmp.lt.s32.totalorder %s13_s0, %s13_s0 }
  0x11   :  { %p39_p5 = scmp.ne.s32.totalorder %s13_s0, %s38_s20  ;;  %p44_p7 = scmp.lt.s32.totalorder %s38_s20, %s38_s20 }
  0x13   :  { %p45_p8 = por %p44_p7, %p43_p6 }
  0x15   :  { %p46_p9 = pnand %p45_p8, %p39_p5 }
  0x17   :  { %49 = shalt.err (!%p46_p9)  }
  0x18   :  { %15 = dma.vmem_to_hbm [thread:$0]  %s13_s0, 3584, %s3_s11, [#allocation1] }
  0x19   :  { %63 = dma.done.wait [#allocation1], 3584  }
  0x1a   :  { %64 = vsyncadd [#allocation1], 4294963712 }
  0x1b   :  { %17 = vsyncpa [#allocation1], 1 }

// kernel: complex_conv2d.1
= control target key start
LH: loop header
LB: loop body
LE: loop exit
PB: predicated region body
PF: predicated region fallthrough
CT: control target
= control target key end

     0   :  { %v1135_v0 = vmov 0.0   ;;  %s1136_s22 = smov 94   ;;  %s1138_s23 = smov 96   ;;  %vm594_vm0 = vcmask 769024   ;;  %vm521_vm1 = vcmask 777216   ;;  %vm448_vm2 = vcmask 785408   ;;  %s1478_s0 = inlined_call_operand.vmem [shape: f32[2,4,256], index: 0, kind: input, shape index: {}]   ;;  %s1479_s1 = inlined_call_operand.vmem [shape: f32[2,4,256], index: 1, kind: input, shape index: {}]   ;;  %s1480_s2 = inlined_call_operand.vmem [shape: f32[8,72], index: 2, kind: input, shape index: {}]   ;;  %s1481_s3 = inlined_call_operand.vmem [shape: f32[2,8,256], index: 3, kind: output, shape index: {0}]   ;;  %s1482_s4 = inlined_call_operand.vmem [shape: f32[2,8,256], index: 4, kind: output, shape index: {1}]  }
   0x1   :  { %16 = vst [vmem:[#allocation2 + $0x30] sm:$0xff] %v1135_v0  ;;  %v28_v1 = vld [vmem:[%s1478_s0] sm:$0xff]  ;;  %v29_v2 = vld [vmem:[%s1478_s0 + $0x8] sm:$0xff]  ;;  %17 = vst [vmem:[#allocation2] sm:$0xff] %v1135_v0  ;;  %796 = vmatprep.mubr.f32.mxu0 %v1135_v0  ;;  %867 = vmatprep.mubr.f32.mxu1 %v1135_v0  ;;  %s1139_s24 = smov 110   ;;  %s1140_s25 = smov 111  }
   0x2   :  { %19 = vst [vmem:[#allocation2 + $0x18] sm:$0xff] %v1135_v0  ;;  %20 = vst [vmem:[#allocation2 + $0x50] sm:$0xff] %v1135_v0  ;;  %v40_v3 = vld [vmem:[%s1479_s1] sm:$0xff]  ;;  %v32_v4 = vcombine.high %v28_v1, %v28_v1  ;;  %v33_v5 = vcombine.high %v29_v2, %v29_v2  ;;  %v41_v7 = vld [vmem:[%s1479_s1 + $0x8] sm:$0xff]  ;;  %1052 = vrot.lane.b32.xlu0 %v1135_v0, %s1136_s22  ;;  %s1137_s1 = smov 95   ;;  %s1141_s26 = smov 112  }
   0x3   :  { %22 = vst [vmem:[#allocation2 + $0x8] sm:$0xff] %v1135_v0  ;;  %23 = vst [vmem:[#allocation2 + $0x38] sm:$0xff] %v1135_v0  ;;  %v44_v6 = vcombine.high %v40_v3, %v40_v3  ;;  %v45_v8 = vcombine.high %v41_v7, %v41_v7  ;;  %s1142_s27 = smov 126   ;;  %s1143_s28 = smov 127   ;;  %vm375_vm3 = vcmask 900096   ;;  %vm302_vm4 = vcmask 908288  }
   0x4   :  { %25 = vst [vmem:[#allocation2 + $0x48] sm:$0xff] %v1135_v0  ;;  %26 = vst [vmem:[#allocation2 + $0x10] sm:$0xff] %v1135_v0  ;;  %vm229_vm5 = vcmask 916480   ;;  %vm156_vm6 = vcmask 1031168   ;;  %vm83_vm7 = vcmask 1039360   ;;  %vm728_vm8 = vcmask 588800  }
   0x5   :  { %36 = vst [vmem:[#allocation2 + $0x30] sm:$0xf] %v28_v1  ;;  %38 = vst [vmem:[#allocation2 + $0x18] sm:$0xf] %v29_v2 }
   0x6   :  { %49 = vst [vmem:[#allocation2 + $0x8] sm:$0xf] %v40_v3  ;;  %51 = vst [vmem:[#allocation2 + $0x48] sm:$0xf] %v41_v7 }
   0x7   :  { %37 = vst [vmem:[#allocation2] sm:$0xf] %v32_v4  ;;  %39 = vst [vmem:[#allocation2 + $0x50] sm:$0xf] %v33_v5 }
   0x8   :  { %50 = vst [vmem:[#allocation2 + $0x38] sm:$0xf] %v44_v6  ;;  %52 = vst [vmem:[#allocation2 + $0x10] sm:$0xf] %v45_v8 }
   0xc   :  { %v1193_v9 = vld [vmem:[#allocation2 + $0x30] sm:$0xff]  ;;  %v1195_v10 = vld [vmem:[#allocation2 + $0x18] sm:$0xff] }
   0xd   :  { %588 = vrot.lane.b32.xlu1 %v1193_v9, %s1136_s22  ;;  %607 = vrot.lane.b32.xlu0 %v1195_v10, %s1136_s22  ;;  %v1289_v15 = vld [vmem:[#allocation2 + $0x8] sm:$0xff] }
   0xe   :  { %v1201_v11 = vld [vmem:[#allocation2 + $0x50] sm:$0xff]  ;;  %v1207_v12 = vld [vmem:[#allocation2] sm:$0xff]  ;;  %v1291_v16 = vld [vmem:[#allocation2 + $0x48] sm:$0xff] }
   0xf   :  { %v1277_v13 = vld [vmem:[#allocation2 + $0x38] sm:$0xff]  ;;  %v1283_v14 = vld [vmem:[#allocation2 + $0x10] sm:$0xff] }
  0x11   :  { %609 = vrot.lane.b32.xlu1 %v1201_v11, %s1136_s22  ;;  %1057 = vrot.lane.b32.xlu0 %v1135_v0, %s1137_s1 }
  0x15   :  { %517 = vrot.lane.b32.xlu1 %v1207_v12, %s1137_s1  ;;  %590 = vrot.lane.b32.xlu0 %v1207_v12, %s1136_s22 }
  0x19   :  { %536 = vrot.lane.b32.xlu1 %v1201_v11, %s1137_s1  ;;  %515 = vrot.lane.b32.xlu0 %v1193_v9, %s1137_s1 }
  0x1d   :  { %534 = vrot.lane.b32.xlu1 %v1195_v10, %s1137_s1  ;;  %444 = vrot.lane.b32.xlu0 %v1207_v12, %s1138_s23 }
  0x21   :  { %1062 = vrot.lane.b32.xlu1 %v1135_v0, %s1138_s23  ;;  %463 = vrot.lane.b32.xlu0 %v1201_v11, %s1138_s23 }
  0x25   :  { %442 = vrot.lane.b32.xlu1 %v1193_v9, %s1138_s23  ;;  %461 = vrot.lane.b32.xlu0 %v1195_v10, %s1138_s23 }
  0x29   :  { %371 = vrot.lane.b32.xlu1 %v1207_v12, %s1139_s24  ;;  %1067 = vrot.lane.b32.xlu0 %v1135_v0, %s1139_s24 }
  0x2d   :  { %390 = vrot.lane.b32.xlu1 %v1201_v11, %s1139_s24  ;;  %369 = vrot.lane.b32.xlu0 %v1193_v9, %s1139_s24 }
  0x31   :  { %388 = vrot.lane.b32.xlu1 %v1195_v10, %s1139_s24  ;;  %298 = vrot.lane.b32.xlu0 %v1207_v12, %s1140_s25 }
  0x35   :  { %1072 = vrot.lane.b32.xlu1 %v1135_v0, %s1140_s25  ;;  %317 = vrot.lane.b32.xlu0 %v1201_v11, %s1140_s25 }
  0x39   :  { %296 = vrot.lane.b32.xlu1 %v1193_v9, %s1140_s25  ;;  %315 = vrot.lane.b32.xlu0 %v1195_v10, %s1140_s25 }
  0x3d   :  { %225 = vrot.lane.b32.xlu1 %v1207_v12, %s1141_s26  ;;  %1077 = vrot.lane.b32.xlu0 %v1135_v0, %s1141_s26 }
  0x41   :  { %244 = vrot.lane.b32.xlu1 %v1201_v11, %s1141_s26  ;;  %223 = vrot.lane.b32.xlu0 %v1193_v9, %s1141_s26 }
  0x45   :  { %242 = vrot.lane.b32.xlu1 %v1195_v10, %s1141_s26  ;;  %152 = vrot.lane.b32.xlu0 %v1207_v12, %s1142_s27 }
  0x49   :  { %1082 = vrot.lane.b32.xlu1 %v1135_v0, %s1142_s27  ;;  %171 = vrot.lane.b32.xlu0 %v1201_v11, %s1142_s27 }
  0x4d   :  { %150 = vrot.lane.b32.xlu1 %v1193_v9, %s1142_s27  ;;  %169 = vrot.lane.b32.xlu0 %v1195_v10, %s1142_s27 }
  0x51   :  { %79 = vrot.lane.b32.xlu1 %v1207_v12, %s1143_s28  ;;  %1087 = vrot.lane.b32.xlu0 %v1135_v0, %s1143_s28 }
  0x55   :  { %98 = vrot.lane.b32.xlu1 %v1201_v11, %s1143_s28  ;;  %77 = vrot.lane.b32.xlu0 %v1193_v9, %s1143_s28 }
  0x59   :  { %96 = vrot.lane.b32.xlu1 %v1195_v10, %s1143_s28  ;;  %627 = vrot.lane.b32.xlu0 %v1277_v13, %s1136_s22 }
  0x5d   :  { %1092 = vrot.lane.b32.xlu1 %v1135_v0, %s1136_s22  ;;  %645 = vrot.lane.b32.xlu0 %v1283_v14, %s1136_s22 }
  0x61   :  { %625 = vrot.lane.b32.xlu1 %v1289_v15, %s1136_s22  ;;  %643 = vrot.lane.b32.xlu0 %v1291_v16, %s1136_s22 }
  0x65   :  { %554 = vrot.lane.b32.xlu1 %v1277_v13, %s1137_s1  ;;  %1097 = vrot.lane.b32.xlu0 %v1135_v0, %s1137_s1 }
  0x69   :  { %572 = vrot.lane.b32.xlu1 %v1283_v14, %s1137_s1  ;;  %552 = vrot.lane.b32.xlu0 %v1289_v15, %s1137_s1 }
  0x6d   :  { %570 = vrot.lane.b32.xlu1 %v1291_v16, %s1137_s1  ;;  %481 = vrot.lane.b32.xlu0 %v1277_v13, %s1138_s23 }
  0x71   :  { %1102 = vrot.lane.b32.xlu1 %v1135_v0, %s1138_s23  ;;  %499 = vrot.lane.b32.xlu0 %v1283_v14, %s1138_s23 }
  0x74   :  { %v1053_v17 = vpop.permute.xlu0 %1052 }
  0x75   :  { %479 = vrot.lane.b32.xlu1 %v1289_v15, %s1138_s23  ;;  %497 = vrot.lane.b32.xlu0 %v1291_v16, %s1138_s23  ;;  %v1055_v20 = vunpack.i.h.bf16 %v1053_v17  ;;  %v1054_v25 = vunpack.i.l.bf16 %v1053_v17 }
  0x79   :  { %408 = vrot.lane.b32.xlu1 %v1277_v13, %s1139_s24  ;;  %1107 = vrot.lane.b32.xlu0 %v1135_v0, %s1139_s24 }
  0x7d   :  { %426 = vrot.lane.b32.xlu1 %v1283_v14, %s1139_s24  ;;  %406 = vrot.lane.b32.xlu0 %v1289_v15, %s1139_s24 }
  0x7f   :  { %v589_v18 = vpop.permute.xlu1 %588  ;;  %v608_v19 = vpop.permute.xlu0 %607 }
  0x81   :  { %424 = vrot.lane.b32.xlu1 %v1291_v16, %s1139_s24  ;;  %335 = vrot.lane.b32.xlu0 %v1277_v13, %s1140_s25 }
  0x83   :  { %v610_v21 = vpop.permute.xlu1 %609  ;;  %v1058_v22 = vpop.permute.xlu0 %1057 }
  0x84   :  { %v614_v23 = vsel %vm594_vm0, %v610_v21, %v1055_v20  ;;  %v613_v24 = vsel %vm594_vm0, %v608_v19, %v610_v21  ;;  %v1059_v26 = vunpack.i.l.bf16 %v1058_v22  ;;  %v1060_v31 = vunpack.i.h.bf16 %v1058_v22 }
  0x85   :  { %817 = vmatprep.subr.mxu1 %v614_v23  ;;  %1112 = vrot.lane.b32.xlu1 %v1135_v0, %s1140_s25 }
  0x86   :  { %818 = vmatpush1.msra.mxu1 %v613_v24  ;;  %353 = vrot.lane.b32.xlu0 %v1283_v14, %s1140_s25 }
  0x87   :  { %v518_v27 = vpop.permute.xlu1 %517  ;;  %v591_v28 = vpop.permute.xlu0 %590 }
  0x88   :  { %v596_v29 = vsel %vm594_vm0, %v591_v28, %v1054_v25  ;;  %v595_v30 = vsel %vm594_vm0, %v589_v18, %v591_v28  ;;  %v523_v32 = vsel %vm521_vm1, %v518_v27, %v1059_v26 }
  0x89   :  { %333 = vrot.lane.b32.xlu1 %v1289_v15, %s1140_s25  ;;  %746 = vmatprep.subr.mxu0 %v596_v29 }
  0x8a   :  { %351 = vrot.lane.b32.xlu0 %v1291_v16, %s1140_s25  ;;  %747 = vmatpush1.msra.mxu0 %v595_v30 }
  0x8b   :  { %v537_v33 = vpop.permute.xlu1 %536  ;;  %v516_v34 = vpop.permute.xlu0 %515  ;;  %748 = vmatprep.subr.mxu0 %v523_v32 }
  0x8c   :  { %v541_v35 = vsel %vm521_vm1, %v537_v33, %v1060_v31  ;;  %v522_v36 = vsel %vm521_vm1, %v516_v34, %v518_v27 }
  0x8d   :  { %819 = vmatprep.subr.mxu1 %v541_v35  ;;  %262 = vrot.lane.b32.xlu1 %v1277_v13, %s1141_s26 }
  0x8e   :  { %749 = vmatpush1.msra.mxu0 %v522_v36  ;;  %1117 = vrot.lane.b32.xlu0 %v1135_v0, %s1141_s26 }
  0x8f   :  { %v535_v37 = vpop.permute.xlu1 %534  ;;  %v445_v38 = vpop.permute.xlu0 %444 }
  0x90   :  { %v540_v39 = vsel %vm521_vm1, %v535_v37, %v537_v33 }
  0x91   :  { %820 = vmatpush1.msra.mxu1 %v540_v39  ;;  %280 = vrot.lane.b32.xlu1 %v1283_v14, %s1141_s26 }
  0x92   :  { %260 = vrot.lane.b32.xlu0 %v1289_v15, %s1141_s26 }
  0x93   :  { %v1063_v40 = vpop.permute.xlu1 %1062  ;;  %v464_v41 = vpop.permute.xlu0 %463 }
  0x94   :  { %v1065_v42 = vunpack.i.h.bf16 %v1063_v40  ;;  %v1064_v43 = vunpack.i.l.bf16 %v1063_v40 }
  0x95   :  { %278 = vrot.lane.b32.xlu1 %v1291_v16, %s1141_s26 }
  0x96   :  { %v450_v44 = vsel %vm448_vm2, %v445_v38, %v1064_v43  ;;  %v468_v45 = vsel %vm448_vm2, %v464_v41, %v1065_v42  ;;  %189 = vrot.lane.b32.xlu0 %v1277_v13, %s1142_s27 }
  0x97   :  { %v443_v46 = vpop.permute.xlu1 %442  ;;  %750 = vmatprep.subr.mxu0 %v450_v44  ;;  %821 = vmatprep.subr.mxu1 %v468_v45  ;;  %v462_v47 = vpop.permute.xlu0 %461 }
  0x98   :  { %v449_v48 = vsel %vm448_vm2, %v443_v46, %v445_v38  ;;  %v467_v49 = vsel %vm448_vm2, %v462_v47, %v464_v41 }
  0x99   :  { %751 = vmatpush1.msra.mxu0 %v449_v48  ;;  %1122 = vrot.lane.b32.xlu1 %v1135_v0, %s1142_s27  ;;  %v1401_v48 = vld [vmem:[%s1480_s2] sm:$0xff] }
  0x9a   :  { %822 = vmatpush1.msra.mxu1 %v467_v49  ;;  %207 = vrot.lane.b32.xlu0 %v1283_v14, %s1142_s27 }
  0x9b   :  { %v372_v50 = vpop.permute.xlu1 %371  ;;  %v1068_v51 = vpop.permute.xlu0 %1067 }
  0x9c   :  { %v1070_v52 = vunpack.i.h.bf16 %v1068_v51  ;;  %v1069_v53 = vunpack.i.l.bf16 %v1068_v51 }
  0x9d   :  { %187 = vrot.lane.b32.xlu1 %v1289_v15, %s1142_s27 }
  0x9e   :  { %205 = vrot.lane.b32.xlu0 %v1291_v16, %s1142_s27  ;;  %v377_v54 = vsel %vm375_vm3, %v372_v50, %v1069_v53 }
  0x9f   :  { %v391_v55 = vpop.permute.xlu1 %390  ;;  %v370_v56 = vpop.permute.xlu0 %369  ;;  %752 = vmatprep.subr.mxu0 %v377_v54 }
  0xa0   :  { %v395_v57 = vsel %vm375_vm3, %v391_v55, %v1070_v52  ;;  %v376_v58 = vsel %vm375_vm3, %v370_v56, %v372_v50 }
  0xa1   :  { %116 = vrot.lane.b32.xlu1 %v1277_v13, %s1143_s28  ;;  %823 = vmatprep.subr.mxu1 %v395_v57 }
  0xa2   :  { %753 = vmatpush1.msra.mxu0 %v376_v58  ;;  %1127 = vrot.lane.b32.xlu0 %v1135_v0, %s1143_s28 }
  0xa3   :  { %v389_v59 = vpop.permute.xlu1 %388  ;;  %v299_v60 = vpop.permute.xlu0 %298 }
  0xa4   :  { %v394_v61 = vsel %vm375_vm3, %v389_v59, %v391_v55 }
  0xa5   :  { %824 = vmatpush1.msra.mxu1 %v394_v61  ;;  %134 = vrot.lane.b32.xlu1 %v1283_v14, %s1143_s28 }
  0xa6   :  { %114 = vrot.lane.b32.xlu0 %v1289_v15, %s1143_s28 }
  0xa7   :  { %v1073_v62 = vpop.permute.xlu1 %1072  ;;  %v318_v63 = vpop.permute.xlu0 %317 }
  0xa8   :  { %v1075_v1 = vunpack.i.h.bf16 %v1073_v62  ;;  %v1074_v2 = vunpack.i.l.bf16 %v1073_v62 }
  0xa9   :  { %132 = vrot.lane.b32.xlu1 %v1291_v16, %s1143_s28 }
  0xaa   :  { %v304_v3 = vsel %vm302_vm4, %v299_v60, %v1074_v2  ;;  %v322_v4 = vsel %vm302_vm4, %v318_v63, %v1075_v1 }
  0xab   :  { %v297_v5 = vpop.permute.xlu1 %296  ;;  %754 = vmatprep.subr.mxu0 %v304_v3  ;;  %825 = vmatprep.subr.mxu1 %v322_v4  ;;  %v316_v6 = vpop.permute.xlu0 %315 }
  0xac   :  { %v303_v7 = vsel %vm302_vm4, %v297_v5, %v299_v60  ;;  %v321_v8 = vsel %vm302_vm4, %v316_v6, %v318_v63 }
  0xad   :  { %755 = vmatpush1.msra.mxu0 %v303_v7  ;;  %826 = vmatpush1.msra.mxu1 %v321_v8 }
  0xaf   :  { %v226_v17 = vpop.permute.xlu1 %225  ;;  %v1078_v18 = vpop.permute.xlu0 %1077 }
  0xb0   :  { %v1080_v19 = vunpack.i.h.bf16 %v1078_v18  ;;  %v1079_v20 = vunpack.i.l.bf16 %v1078_v18 }
  0xb2   :  { %v231_v21 = vsel %vm229_vm5, %v226_v17, %v1079_v20 }
  0xb3   :  { %v245_v22 = vpop.permute.xlu1 %244  ;;  %v224_v23 = vpop.permute.xlu0 %223  ;;  %756 = vmatprep.subr.mxu0 %v231_v21 }
  0xb4   :  { %v249_v24 = vsel %vm229_vm5, %v245_v22, %v1080_v19  ;;  %v230_v25 = vsel %vm229_vm5, %v224_v23, %v226_v17 }
  0xb5   :  { %827 = vmatprep.subr.mxu1 %v249_v24  ;;  %757 = vmatpush1.msra.mxu0 %v230_v25 }
  0xb7   :  { %v243_v26 = vpop.permute.xlu1 %242  ;;  %v153_v27 = vpop.permute.xlu0 %152 }
  0xb8   :  { %v248_v28 = vsel %vm229_vm5, %v243_v26, %v245_v22 }
  0xb9   :  { %828 = vmatpush1.msra.mxu1 %v248_v28 }
  0xbb   :  { %v1083_v29 = vpop.permute.xlu1 %1082  ;;  %v172_v30 = vpop.permute.xlu0 %171 }
  0xbc   :  { %v1085_v31 = vunpack.i.h.bf16 %v1083_v29  ;;  %v1084_v32 = vunpack.i.l.bf16 %v1083_v29 }
  0xbe   :  { %v158_v33 = vsel %vm156_vm6, %v153_v27, %v1084_v32  ;;  %v176_v34 = vsel %vm156_vm6, %v172_v30, %v1085_v31 }
  0xbf   :  { %v151_v35 = vpop.permute.xlu1 %150  ;;  %758 = vmatprep.subr.mxu0 %v158_v33  ;;  %829 = vmatprep.subr.mxu1 %v176_v34  ;;  %v170_v36 = vpop.permute.xlu0 %169 }
  0xc0   :  { %v157_v37 = vsel %vm156_vm6, %v151_v35, %v153_v27  ;;  %v175_v38 = vsel %vm156_vm6, %v170_v36, %v172_v30 }
  0xc1   :  { %759 = vmatpush1.msra.mxu0 %v157_v37  ;;  %830 = vmatpush1.msra.mxu1 %v175_v38 }
  0xc3   :  { %v80_v39 = vpop.permute.xlu1 %79  ;;  %v1088_v40 = vpop.permute.xlu0 %1087 }
  0xc4   :  { %v1090_v41 = vunpack.i.h.bf16 %v1088_v40  ;;  %v1089_v42 = vunpack.i.l.bf16 %v1088_v40 }
  0xc6   :  { %v85_v43 = vsel %vm83_vm7, %v80_v39, %v1089_v42 }
  0xc7   :  { %v99_v44 = vpop.permute.xlu1 %98  ;;  %v78_v45 = vpop.permute.xlu0 %77  ;;  %760 = vmatprep.subr.mxu0 %v85_v43 }
  0xc8   :  { %v103_v46 = vsel %vm83_vm7, %v99_v44, %v1090_v41  ;;  %v84_v47 = vsel %vm83_vm7, %v78_v45, %v80_v39 }
  0xc9   :  { %831 = vmatprep.subr.mxu1 %v103_v46  ;;  %761 = vmatpush1.msra.mxu0 %v84_v47 }
  0xca   :  { %762 = vmatprep.subr.mxu0 %v1207_v12 }
  0xcb   :  { %v97_v49 = vpop.permute.xlu1 %96  ;;  %v628_v50 = vpop.permute.xlu0 %627  ;;  %763 = vmatpush1.msra.mxu0 %v1193_v9 }
  0xcc   :  { %v102_v51 = vsel %vm83_vm7, %v97_v49, %v99_v44  ;;  %1034 = vmatmul.mubr.msk.f32.vlgmr.msra.gmra.mxu0 %vm728_vm8, %v1401_v48 }
  0xcd   :  { %832 = vmatpush1.msra.mxu1 %v102_v51  ;;  %938 = vmatprep.mubr.f32.mxu0 %v1135_v0 }
  0xce   :  { %833 = vmatprep.subr.mxu1 %v1201_v11 }
  0xcf   :  { %v1093_v52 = vpop.permute.xlu1 %1092  ;;  %v646_v53 = vpop.permute.xlu0 %645  ;;  %834 = vmatpush1.msra.mxu1 %v1195_v10 }
  0xd0   :  { %v1095_v54 = vunpack.i.h.bf16 %v1093_v52  ;;  %v1094_v12 = vunpack.i.l.bf16 %v1093_v52  ;;  %1035 = vmatmul.mubr.msk.f32.vlgmr.msra.gmra.mxu1 %vm728_vm8, %v1401_v48 }
  0xd1   :  { %1009 = vmatprep.mubr.f32.mxu1 %v1135_v0 }
  0xd2   :  { %v632_v9 = vsel %vm594_vm0, %v628_v50, %v1094_v12  ;;  %v650_v55 = vsel %vm594_vm0, %v646_v53, %v1095_v54 }
  0xd3   :  { %v626_v56 = vpop.permute.xlu1 %625  ;;  %888 = vmatprep.subr.mxu0 %v632_v9  ;;  %959 = vmatprep.subr.mxu1 %v650_v55  ;;  %v644_v57 = vpop.permute.xlu0 %643 }
  0xd4   :  { %v631_v11 = vsel %vm594_vm0, %v626_v56, %v628_v50  ;;  %v649_v58 = vsel %vm594_vm0, %v644_v57, %v646_v53 }
  0xd5   :  { %889 = vmatpush1.msra.mxu0 %v631_v11  ;;  %960 = vmatpush1.msra.mxu1 %v649_v58 }
  0xd7   :  { %v555_v10 = vpop.permute.xlu1 %554  ;;  %v1098_v59 = vpop.permute.xlu0 %1097 }
  0xd8   :  { %v1100_v60 = vunpack.i.h.bf16 %v1098_v59  ;;  %v1099_v61 = vunpack.i.l.bf16 %v1098_v59 }
  0xda   :  { %v559_v0 = vsel %vm521_vm1, %v555_v10, %v1099_v61 }
  0xdb   :  { %v573_v62 = vpop.permute.xlu1 %572  ;;  %v553_v63 = vpop.permute.xlu0 %552  ;;  %890 = vmatprep.subr.mxu0 %v559_v0 }
  0xdc   :  { %v558_v1 = vsel %vm521_vm1, %v553_v63, %v555_v10  ;;  %v577_v2 = vsel %vm521_vm1, %v573_v62, %v1100_v60 }
  0xdd   :  { %961 = vmatprep.subr.mxu1 %v577_v2  ;;  %891 = vmatpush1.msra.mxu0 %v558_v1 }
  0xdf   :  { %v571_v3 = vpop.permute.xlu1 %570  ;;  %v482_v4 = vpop.permute.xlu0 %481 }
  0xe0   :  { %v576_v5 = vsel %vm521_vm1, %v571_v3, %v573_v62 }
  0xe1   :  { %962 = vmatpush1.msra.mxu1 %v576_v5 }
  0xe3   :  { %v1103_v6 = vpop.permute.xlu1 %1102  ;;  %v500_v7 = vpop.permute.xlu0 %499 }
  0xe4   :  { %v1105_v8 = vunpack.i.h.bf16 %v1103_v6  ;;  %v1104_v17 = vunpack.i.l.bf16 %v1103_v6 }
  0xe6   :  { %v486_v18 = vsel %vm448_vm2, %v482_v4, %v1104_v17  ;;  %v504_v19 = vsel %vm448_vm2, %v500_v7, %v1105_v8 }
  0xe7   :  { %v480_v20 = vpop.permute.xlu1 %479  ;;  %892 = vmatprep.subr.mxu0 %v486_v18  ;;  %963 = vmatprep.subr.mxu1 %v504_v19  ;;  %v498_v21 = vpop.permute.xlu0 %497 }
  0xe8   :  { %v485_v22 = vsel %vm448_vm2, %v480_v20, %v482_v4  ;;  %v503_v23 = vsel %vm448_vm2, %v498_v21, %v500_v7 }
  0xe9   :  { %893 = vmatpush1.msra.mxu0 %v485_v22  ;;  %964 = vmatpush1.msra.mxu1 %v503_v23 }
  0xeb   :  { %v409_v24 = vpop.permute.xlu1 %408  ;;  %v1108_v25 = vpop.permute.xlu0 %1107 }
  0xec   :  { %v1110_v26 = vunpack.i.h.bf16 %v1108_v25  ;;  %v1109_v27 = vunpack.i.l.bf16 %v1108_v25 }
  0xee   :  { %v413_v28 = vsel %vm375_vm3, %v409_v24, %v1109_v27 }
  0xef   :  { %v427_v29 = vpop.permute.xlu1 %426  ;;  %v407_v30 = vpop.permute.xlu0 %406  ;;  %894 = vmatprep.subr.mxu0 %v413_v28 }
  0xf0   :  { %v412_v31 = vsel %vm375_vm3, %v407_v30, %v409_v24  ;;  %v431_v32 = vsel %vm375_vm3, %v427_v29, %v1110_v26 }
  0xf1   :  { %965 = vmatprep.subr.mxu1 %v431_v32  ;;  %895 = vmatpush1.msra.mxu0 %v412_v31 }
  0xf3   :  { %v425_v33 = vpop.permute.xlu1 %424  ;;  %v336_v34 = vpop.permute.xlu0 %335 }
  0xf4   :  { %v430_v35 = vsel %vm375_vm3, %v425_v33, %v427_v29 }
  0xf5   :  { %966 = vmatpush1.msra.mxu1 %v430_v35 }
  0xf7   :  { %v1113_v36 = vpop.permute.xlu1 %1112 }
  0xf8   :  { %v1115_v37 = vunpack.i.h.bf16 %v1113_v36  ;;  %v1114_v38 = vunpack.i.l.bf16 %v1113_v36  ;;  %v354_v39 = vpop.permute.xlu0 %353 }
  0xfa   :  { %v340_v40 = vsel %vm302_vm4, %v336_v34, %v1114_v38  ;;  %v358_v41 = vsel %vm302_vm4, %v354_v39, %v1115_v37 }
  0xfb   :  { %v334_v42 = vpop.permute.xlu1 %333  ;;  %896 = vmatprep.subr.mxu0 %v340_v40  ;;  %967 = vmatprep.subr.mxu1 %v358_v41 }
  0xfc   :  { %v339_v43 = vsel %vm302_vm4, %v334_v42, %v336_v34  ;;  %v352_v44 = vpop.permute.xlu0 %351 }
  0xfd   :  { %897 = vmatpush1.msra.mxu0 %v339_v43  ;;  %v357_v45 = vsel %vm302_vm4, %v352_v44, %v354_v39 }
  0xfe   :  { %968 = vmatpush1.msra.mxu1 %v357_v45 }
  0xff   :  { %v263_v46 = vpop.permute.xlu1 %262 }
 0x100   :  { %v1118_v47 = vpop.permute.xlu0 %1117 }
 0x101   :  { %v1120_v49 = vunpack.i.h.bf16 %v1118_v47  ;;  %v1119_v50 = vunpack.i.l.bf16 %v1118_v47 }
 0x103   :  { %v281_v51 = vpop.permute.xlu1 %280  ;;  %v267_v52 = vsel %vm229_vm5, %v263_v46, %v1119_v50 }
 0x104   :  { %v261_v53 = vpop.permute.xlu0 %260  ;;  %898 = vmatprep.subr.mxu0 %v267_v52  ;;  %v285_v54 = vsel %vm229_vm5, %v281_v51, %v1120_v49 }
 0x105   :  { %v266_v12 = vsel %vm229_vm5, %v261_v53, %v263_v46  ;;  %969 = vmatprep.subr.mxu1 %v285_v54 }
 0x106   :  { %899 = vmatpush1.msra.mxu0 %v266_v12 }
 0x107   :  { %v279_v9 = vpop.permute.xlu1 %278 }
 0x108   :  { %v284_v55 = vsel %vm229_vm5, %v279_v9, %v281_v51  ;;  %v190_v56 = vpop.permute.xlu0 %189 }
 0x109   :  { %970 = vmatpush1.msra.mxu1 %v284_v55 }
 0x10b   :  { %v1123_v57 = vpop.permute.xlu1 %1122 }
 0x10c   :  { %v1125_v11 = vunpack.i.h.bf16 %v1123_v57  ;;  %v1124_v58 = vunpack.i.l.bf16 %v1123_v57  ;;  %v208_v10 = vpop.permute.xlu0 %207 }
 0x10e   :  { %v194_v59 = vsel %vm156_vm6, %v190_v56, %v1124_v58  ;;  %v212_v60 = vsel %vm156_vm6, %v208_v10, %v1125_v11 }
 0x10f   :  { %v188_v61 = vpop.permute.xlu1 %187  ;;  %900 = vmatprep.subr.mxu0 %v194_v59  ;;  %971 = vmatprep.subr.mxu1 %v212_v60 }
 0x110   :  { %v193_v0 = vsel %vm156_vm6, %v188_v61, %v190_v56  ;;  %v206_v62 = vpop.permute.xlu0 %205 }
 0x111   :  { %901 = vmatpush1.msra.mxu0 %v193_v0  ;;  %v211_v63 = vsel %vm156_vm6, %v206_v62, %v208_v10 }
 0x112   :  { %972 = vmatpush1.msra.mxu1 %v211_v63 }
 0x113   :  { %v117_v1 = vpop.permute.xlu1 %116 }
 0x114   :  { %v1128_v2 = vpop.permute.xlu0 %1127 }
 0x115   :  { %v1130_v3 = vunpack.i.h.bf16 %v1128_v2  ;;  %v1129_v4 = vunpack.i.l.bf16 %v1128_v2 }
 0x117   :  { %v135_v5 = vpop.permute.xlu1 %134  ;;  %v121_v6 = vsel %vm83_vm7, %v117_v1, %v1129_v4 }
 0x118   :  { %v115_v7 = vpop.permute.xlu0 %114  ;;  %902 = vmatprep.subr.mxu0 %v121_v6  ;;  %v139_v8 = vsel %vm83_vm7, %v135_v5, %v1130_v3 }
 0x119   :  { %v120_v17 = vsel %vm83_vm7, %v115_v7, %v117_v1  ;;  %973 = vmatprep.subr.mxu1 %v139_v8 }
 0x11a   :  { %903 = vmatpush1.msra.mxu0 %v120_v17 }
 0x11b   :  { %v133_v18 = vpop.permute.xlu1 %132  ;;  %904 = vmatprep.subr.mxu0 %v1277_v13 }
 0x11c   :  { %v138_v19 = vsel %vm83_vm7, %v133_v18, %v135_v5  ;;  %905 = vmatpush1.msra.mxu0 %v1289_v15 }
 0x11d   :  { %974 = vmatpush1.msra.mxu1 %v138_v19  ;;  %1036 = vmatmul.mubr.msk.f32.vlgmr.msra.gmra.mxu0 %vm728_vm8, %v1401_v48 }
 0x11e   :  { %975 = vmatprep.subr.mxu1 %v1283_v14 }
 0x11f   :  { %976 = vmatpush1.msra.mxu1 %v1291_v16 }
 0x120   :  { %1037 = vmatmul.mubr.msk.f32.vlgmr.msra.gmra.mxu1 %vm728_vm8, %v1401_v48 }
 0x18c   :  { %v798_v20 = vpop.f32.mrf.mxu0 }
 0x18d   :  { %1016 = vst [vmem:[%s1481_s3] sm:$0xff] %v798_v20 }
 0x18e   :  { %v800_v13 = vpop.f32.mrf.mxu0 }
 0x18f   :  { %1017 = vst [vmem:[%s1481_s3 + $0x8] sm:$0xff] %v800_v13 }
 0x190   :  { %v869_v15 = vpop.f32.mrf.mxu1 }
 0x191   :  { %1038 = vst [vmem:[%s1481_s3 + $0x10] sm:$0xff] %v869_v15 }
 0x192   :  { %v871_v14 = vpop.f32.mrf.mxu1 }
 0x193   :  { %1039 = vst [vmem:[%s1481_s3 + $0x18] sm:$0xff] %v871_v14 }
 0x1dd   :  { %v940_v16 = vpop.f32.mrf.mxu0 }
 0x1de   :  { %1018 = vst [vmem:[%s1482_s4] sm:$0xff] %v940_v16 }
 0x1df   :  { %v942_v48 = vpop.f32.mrf.mxu0 }
 0x1e0   :  { %v1011_v21 = vpop.f32.mrf.mxu1  ;;  %1019 = vst [vmem:[%s1482_s4 + $0x8] sm:$0xff] %v942_v48 }
 0x1e1   :  { %1040 = vst [vmem:[%s1482_s4 + $0x10] sm:$0xff] %v1011_v21 }
 0x1e2   :  { %v1013_v22 = vpop.f32.mrf.mxu1 }
 0x1e3   :  { %1041 = vst [vmem:[%s1482_s4 + $0x18] sm:$0xff] %v1013_v22 }

</bundles_post_ra>
